<compile_context>
chip_gen: v7x
topology: tpu7x:2x2x1
jax: 0.10.0
libtpu: 0.0.40
codegen_flags: <defaults>
</compile_context>

<pallas_src>
import functools

import jax
import jax.numpy as jnp
from jax.experimental import pallas as pl
from jax.experimental.pallas import tpu as pltpu


def _round_up(a, b):
    return (a + b - 1) // b * b


@functools.lru_cache(maxsize=None)
def _vmem_budget_bytes():
    """~88% of physical per-core VMEM (leaves headroom for Mosaic internal scratch)."""
    try:
        cap = pltpu.get_tpu_info().vmem_capacity_bytes
    except Exception:
        cap = 64 << 20  # conservative fallback: v7x per-TensorCore VMEM
    return int(0.88 * cap)


def _pick_token_tile(M, tm):
    """8-aligned token tile: big enough to amortize per-step overhead, small enough to
    avoid heavy last-tile padding, and giving >= 2 grid steps (v7x megacore)."""
    tm_eff = min(tm, _round_up(M, 8))
    # Cap padding waste at ~tm/4 (don't shrink below 64: tiny tiles cost more than pad).
    while tm_eff > 64 and (_round_up(M, tm_eff) - M) > tm_eff // 4:
        tm_eff = _round_up(tm_eff // 2, 8)
    # Keep >= 2 token steps so dimension_semantics=("parallel", ...) feeds both v7x TCs.
    if _round_up(M, tm_eff) // tm_eff < 2 and tm_eff > 8:
        tm_eff = _round_up(tm_eff // 2, 8)
    return tm_eff, _round_up(M, tm_eff)


def _slab_need_bytes(C, H, th, tm, w_itemsize, out_itemsize):
    nbuf = 1 if th == H else 2                      # resident vs pipelined weight slabs
    return (nbuf * 2 * C * th * w_itemsize          # W1 slab + W2 slab
            + nbuf * th * 4 + C * 4                 # b1 slab (f32) + b2 (f32)
            + 2 * tm * C * w_itemsize               # x tile (bf16), double buffered
            + 2 * tm * C * out_itemsize             # out tile, double buffered
            + tm * C * 4                            # fp32 accumulator scratch
            + tm * th * 6)                          # fp32 h + bf16 h intermediates


def _pick_hidden_slab(C, H, tm, w_itemsize, out_itemsize, budget):
    """Largest th (H itself, or a multiple-of-128 divisor of H) whose working set fits."""
    cands = [H] + [d for d in range(H - 128, 127, -128) if H % d == 0]
    for th in cands:
        if int(1.3 * _slab_need_bytes(C, H, th, tm, w_itemsize, out_itemsize)) <= budget:
            return th
    return cands[-1]


def mlp_kernel(x_ref, w1_ref, b1_ref, w2_ref, b2_ref, o_ref, acc_ref):
    # x_ref: (TM, C) bf16, w1_ref: (C, TH) bf16, b1_ref: (1, TH) f32,
    # w2_ref: (TH, C) bf16, b2_ref: (1, C) f32, o_ref: (TM, C), acc_ref: (TM, C) f32.
    j = pl.program_id(1)

    @pl.when(j == 0)
    def _init():
        acc_ref[...] = jnp.zeros_like(acc_ref)

    # c_fc slab: (TM,C)@(C,TH), bf16 operands, fp32 accumulation on the MXU.
    h = jnp.dot(x_ref[...], w1_ref[...], preferred_element_type=jnp.float32)
    h = h + b1_ref[...]

    # Exact GELU (matches torch.nn.GELU(approximate='none')); elementwise in H -> slab-exact.
    # TODO(synk): on v6e/v7x consider bf16 GELU (or tanh-approx on the EUP) once numerics
    # vs the exact-erf reference are signed off; kept fp32 here for fidelity (and v5e).
    h = 0.5 * h * (1.0 + jax.lax.erf(h * jnp.float32(0.7071067811865476)))

    # c_proj slab: accumulate (TM,TH)@(TH,C) into the fp32 accumulator (bf16 MXU feed).
    acc_ref[...] += jnp.dot(h.astype(w2_ref.dtype), w2_ref[...],
                            preferred_element_type=jnp.float32)

    @pl.when(j == pl.num_programs(1) - 1)
    def _finalize():
        # Dropout is identity (inference / p=0.0).
        # TODO(synk): training-mode dropout would use pltpu.prng_seed + stateful_bernoulli.
        o_ref[...] = (acc_ref[...] + b2_ref[...]).astype(o_ref.dtype)


@functools.partial(jax.jit, static_argnames=("tm",))
def mlp_forward(x, w1_t, b1, w2_t, b2, *, tm=256):
    """x: (B,T,C) f32/bf16; w1_t: (C,H); b1: (H,); w2_t: (H,C); b2: (C,).
    For production runs, C and H should be multiples of 128 (lane-dense stores,
    full-width MXU); the toy demo below uses C=32 only for a quick correctness check."""
    B, T, C = x.shape
    H = w1_t.shape[1]
    M = B * T
    out_dtype = x.dtype

    tm_eff, M_pad = _pick_token_tile(M, tm)

    # Feed the MXU bf16 (native dtype on v5e/v6e/v7x); fp32 accumulation is preserved
    # via preferred_element_type in the kernel. Biases are pre-cast to f32 once here.
    x2d = x.reshape(M, C).astype(jnp.bfloat16)
    if M_pad != M:
        x2d = jnp.pad(x2d, ((0, M_pad - M), (0, 0)))
    w1b = w1_t.astype(jnp.bfloat16)
    w2b = w2_t.astype(jnp.bfloat16)
    b1_2d = b1.reshape(1, H).astype(jnp.float32)
    b2_2d = b2.reshape(1, C).astype(jnp.float32)

    budget = _vmem_budget_bytes()
    th = _pick_hidden_slab(C, H, tm_eff, w1b.dtype.itemsize,
                           jnp.dtype(out_dtype).itemsize, budget)
    n_h = H // th

    need = _slab_need_bytes(C, H, th, tm_eff, w1b.dtype.itemsize,
                            jnp.dtype(out_dtype).itemsize)
    vmem_limit = min(budget, max(32 << 20, int(1.3 * need)))

    cost = pl.CostEstimate(
        flops=4 * M_pad * C * H,                    # two matmuls, 2*M*C*H each
        transcendentals=M_pad * H,                  # erf
        bytes_accessed=(x2d.size * x2d.dtype.itemsize
                        + w1b.size * w1b.dtype.itemsize
                        + w2b.size * w2b.dtype.itemsize
                        + (H + C) * 4
                        + M_pad * C * jnp.dtype(out_dtype).itemsize),
    )

    # Single-buffer operands whose block index is constant over the whole grid
    # (halves their VMEM residency); slab-varying weights keep default double buffering.
    resident = pl.Buffered(1)

    def _wspec(shape, idx):
        if n_h == 1:
            return pl.BlockSpec(shape, idx, pipeline_mode=resident)
        return pl.BlockSpec(shape, idx)

    out = pl.pallas_call(
        mlp_kernel,
        out_shape=jax.ShapeDtypeStruct((M_pad, C), out_dtype),
        grid_spec=pltpu.PrefetchScalarGridSpec(
            num_scalar_prefetch=0,
            grid=(M_pad // tm_eff, n_h),                       # H-slab (reduction) axis last
            in_specs=[
                pl.BlockSpec((tm_eff, C), lambda i, j: (i, 0)),                    # x tile
                _wspec((C, th), lambda i, j: (0, j)),                              # W1^T slab
                _wspec((1, th), lambda i, j: (0, j)),                              # b1 slab
                _wspec((th, C), lambda i, j: (j, 0)),                              # W2^T slab
                pl.BlockSpec((1, C), lambda i, j: (0, 0), pipeline_mode=resident),  # b2
            ],
            out_specs=pl.BlockSpec((tm_eff, C), lambda i, j: (i, 0)),
            scratch_shapes=[pltpu.VMEM((tm_eff, C), jnp.float32)],  # fp32 accumulator
        ),
        compiler_params=pltpu.CompilerParams(
            dimension_semantics=("parallel", "arbitrary"),
            vmem_limit_bytes=vmem_limit,
        ),
        cost_estimate=cost,
    )(x2d, w1b, b1_2d, w2b, b2_2d)

    if M_pad != M:
        out = out[:M]  # padded token rows hold garbage (GELU(b1)@W2 + b2); drop them
    return out.reshape(B, T, C)


def reference_mlp_f32(x, w1_t, b1, w2_t, b2):
    """Full-precision exact-GELU reference (matches the PyTorch module in f32)."""
    h = x @ w1_t + b1
    h = 0.5 * h * (1.0 + jax.lax.erf(h * jnp.float32(0.7071067811865476)))
    return h @ w2_t + b2


def reference_mlp_bf16(x, w1_t, b1, w2_t, b2):
    """Reference that mirrors the kernel's bf16 MXU feed + fp32 accumulation."""
    f32, bf16 = jnp.float32, jnp.bfloat16
    xb = x.astype(bf16).astype(f32)
    w1b = w1_t.astype(bf16).astype(f32)
    w2b = w2_t.astype(bf16).astype(f32)
    h = xb @ w1b + b1.astype(f32)
    h = 0.5 * h * (1.0 + jax.lax.erf(h * jnp.float32(0.7071067811865476)))
    h = h.astype(bf16).astype(f32)
    return (h @ w2b + b2.astype(f32)).astype(x.dtype)


if __name__ == "__main__":
    # config: n_embd=32, bias=True, dropout=0.0 (identity at inference)
    B, T, C = 2, 8, 32
    H = 4 * C

    key = jax.random.PRNGKey(0)
    kx, k1, kb1, k2, kb2 = jax.random.split(key, 5)

    x = jax.random.normal(kx, (B, T, C), dtype=jnp.float32)

    # Deterministic init mimicking nn.Linear's U(-1/sqrt(fan_in), 1/sqrt(fan_in)),
    # stored already transposed: (in, out).
    bound1 = 1.0 / (C ** 0.5)
    w1_t = jax.random.uniform(k1, (C, H), jnp.float32, -bound1, bound1)
    b1 = jax.random.uniform(kb1, (H,), jnp.float32, -bound1, bound1)
    bound2 = 1.0 / (H ** 0.5)
    w2_t = jax.random.uniform(k2, (H, C), jnp.float32, -bound2, bound2)
    b2 = jax.random.uniform(kb2, (C,), jnp.float32, -bound2, bound2)

    y = jax.block_until_ready(mlp_forward(x, w1_t, b1, w2_t, b2))
    assert y.shape == (B, T, C)

    # Tight check against a reference with the same bf16 cast points as the kernel.
    y_ref = reference_mlp_bf16(x, w1_t, b1, w2_t, b2)
    assert jnp.allclose(y, y_ref, atol=1e-3, rtol=1e-3), \
        float(jnp.max(jnp.abs(y - y_ref)))

    # Loose sanity check against the full-precision exact-GELU reference
    # (bf16 MXU feed -> bf16-level tolerance).
    y_f32 = reference_mlp_f32(x, w1_t, b1, w2_t, b2)
    assert jnp.allclose(y, y_f32, atol=3e-2, rtol=3e-2), \
        float(jnp.max(jnp.abs(y - y_f32)))

    print("KERNEL_OK")
</pallas_src>

<mosaic_0001>
module attributes {stable_mosaic.version = 11 : i64} {
  func.func @mlp_kernel(%arg0: i32, %arg1: i32, %arg2: memref<8x32xbf16, #tpu.memory_space<vmem>>, %arg3: memref<32x128xbf16, #tpu.memory_space<vmem>>, %arg4: memref<1x128xf32, #tpu.memory_space<vmem>>, %arg5: memref<128x32xbf16, #tpu.memory_space<vmem>>, %arg6: memref<1x32xf32, #tpu.memory_space<vmem>>, %arg7: memref<8x32xf32, #tpu.memory_space<vmem>>, %arg8: memref<8x32xf32, #tpu.memory_space<vmem>>) attributes {dimension_semantics = [#tpu.dimension_semantics<parallel>, #tpu.dimension_semantics<arbitrary>], iteration_bounds = array<i64: 2, 1>, scalar_prefetch = 0 : i64, scratch_operands = 1 : i64, tpu.core_type = #tpu.core_type<tc>, window_params = [{transform_indices = @transform_0, window_bounds = array<i64: 8, 32>}, {pipeline_mode = #tpu.pipeline_mode<synchronous>, transform_indices = @transform_1, window_bounds = array<i64: 32, 128>}, {pipeline_mode = #tpu.pipeline_mode<synchronous>, transform_indices = @transform_2, window_bounds = array<i64: 1, 128>}, {pipeline_mode = #tpu.pipeline_mode<synchronous>, transform_indices = @transform_3, window_bounds = array<i64: 128, 32>}, {pipeline_mode = #tpu.pipeline_mode<synchronous>, transform_indices = @transform_4, window_bounds = array<i64: 1, 32>}, {transform_indices = @transform_5, window_bounds = array<i64: 8, 32>}]} {
    %c0_i32 = arith.constant 0 : i32
    %0 = arith.cmpi eq, %arg1, %c0_i32 : i32
    %1 = arith.extui %0 : i1 to i32
    %c0_i32_0 = arith.constant 0 : i32
    %2 = arith.cmpi ne, %1, %c0_i32_0 : i32
    scf.if %2 {
      %cst_18 = arith.constant 0.000000e+00 : f32
      %26 = vector.broadcast %cst_18 : f32 to vector<8x32xf32>
      %c0_19 = arith.constant 0 : index
      %c0_20 = arith.constant 0 : index
      %27 = vector.load %arg8[%c0_19, %c0_20] : memref<8x32xf32, #tpu.memory_space<vmem>>, vector<8x32xf32>
      tpu.vector_store %arg8[%c0_19, %c0_20], %26 {strides = array<i32>} : memref<8x32xf32, #tpu.memory_space<vmem>>, vector<8x32xf32>,
    } else {
    }
    %c0 = arith.constant 0 : index
    %c0_1 = arith.constant 0 : index
    %3 = vector.load %arg2[%c0, %c0_1] : memref<8x32xbf16, #tpu.memory_space<vmem>>, vector<8x32xbf16>
    %c0_2 = arith.constant 0 : index
    %c0_3 = arith.constant 0 : index
    %4 = vector.load %arg3[%c0_2, %c0_3] : memref<32x128xbf16, #tpu.memory_space<vmem>>, vector<32x128xbf16>
    %cst = arith.constant dense<0.000000e+00> : vector<8x128xf32>
    %5 = tpu.matmul %3, %4, %cst {dimension_numbers = #tpu.dot_dimension_numbers<[1], [0], [0], [1], [0, 0, 1, 1], [], []>} : vector<8x32xbf16>, vector<32x128xbf16>, vector<8x128xf32> -> vector<8x128xf32>
    %c0_4 = arith.constant 0 : index
    %c0_5 = arith.constant 0 : index
    %6 = vector.load %arg4[%c0_4, %c0_5] : memref<1x128xf32, #tpu.memory_space<vmem>>, vector<1x128xf32>
    %7 = vector.broadcast %6 : vector<1x128xf32> to vector<8x128xf32>
    %8 = arith.addf %5, %7 : vector<8x128xf32>
    %cst_6 = arith.constant 5.000000e-01 : f32
    %9 = vector.broadcast %cst_6 : f32 to vector<8x128xf32>
    %10 = arith.mulf %9, %8 : vector<8x128xf32>
    %cst_7 = arith.constant 0.707106769 : f32
    %11 = vector.broadcast %cst_7 : f32 to vector<8x128xf32>
    %12 = arith.mulf %8, %11 : vector<8x128xf32>
    %13 = math.erf %12 : vector<8x128xf32>
    %cst_8 = arith.constant 1.000000e+00 : f32
    %14 = vector.broadcast %cst_8 : f32 to vector<8x128xf32>
    %15 = arith.addf %14, %13 : vector<8x128xf32>
    %16 = arith.mulf %10, %15 : vector<8x128xf32>
    %c0_9 = arith.constant 0 : index
    %c0_10 = arith.constant 0 : index
    %17 = vector.load %arg8[%c0_9, %c0_10] : memref<8x32xf32, #tpu.memory_space<vmem>>, vector<8x32xf32>
    %18 = arith.truncf %16 : vector<8x128xf32> to vector<8x128xbf16>
    %c0_11 = arith.constant 0 : index
    %c0_12 = arith.constant 0 : index
    %19 = vector.load %arg5[%c0_11, %c0_12] : memref<128x32xbf16, #tpu.memory_space<vmem>>, vector<128x32xbf16>
    %cst_13 = arith.constant dense<0.000000e+00> : vector<8x32xf32>
    %20 = tpu.matmul %18, %19, %cst_13 {dimension_numbers = #tpu.dot_dimension_numbers<[1], [0], [0], [1], [0, 0, 1, 1], [], []>} : vector<8x128xbf16>, vector<128x32xbf16>, vector<8x32xf32> -> vector<8x32xf32>
    %21 = arith.addf %17, %20 : vector<8x32xf32>
    %c0_14 = arith.constant 0 : index
    %c0_15 = arith.constant 0 : index
    %22 = vector.load %arg8[%c0_14, %c0_15] : memref<8x32xf32, #tpu.memory_space<vmem>>, vector<8x32xf32>
    tpu.vector_store %arg8[%c0_14, %c0_15], %21 {strides = array<i32>} : memref<8x32xf32, #tpu.memory_space<vmem>>, vector<8x32xf32>,
    %c0_i32_16 = arith.constant 0 : i32
    %23 = arith.cmpi eq, %arg1, %c0_i32_16 : i32
    %24 = arith.extui %23 : i1 to i32
    %c0_i32_17 = arith.constant 0 : i32
    %25 = arith.cmpi ne, %24, %c0_i32_17 : i32
    scf.if %25 {
      %c0_18 = arith.constant 0 : index
      %c0_19 = arith.constant 0 : index
      %26 = vector.load %arg8[%c0_18, %c0_19] : memref<8x32xf32, #tpu.memory_space<vmem>>, vector<8x32xf32>
      %c0_20 = arith.constant 0 : index
      %c0_21 = arith.constant 0 : index
      %27 = vector.load %arg6[%c0_20, %c0_21] : memref<1x32xf32, #tpu.memory_space<vmem>>, vector<1x32xf32>
      %28 = vector.broadcast %27 : vector<1x32xf32> to vector<8x32xf32>
      %29 = arith.addf %26, %28 : vector<8x32xf32>
      %c0_22 = arith.constant 0 : index
      %c0_23 = arith.constant 0 : index
      %30 = vector.load %arg7[%c0_22, %c0_23] : memref<8x32xf32, #tpu.memory_space<vmem>>, vector<8x32xf32>
      tpu.vector_store %arg7[%c0_22, %c0_23], %29 {strides = array<i32>} : memref<8x32xf32, #tpu.memory_space<vmem>>, vector<8x32xf32>,
    } else {
    }
    return
  }
  func.func @transform_0(%arg0: i32, %arg1: i32) -> (i32, i32) {
    %c0_i32 = arith.constant 0 : i32
    %c0_i32_0 = arith.constant 0 : i32
    return %arg0, %c0_i32 : i32, i32
  }
  func.func @transform_1(%arg0: i32, %arg1: i32) -> (i32, i32) {
    %c0_i32 = arith.constant 0 : i32
    %c0_i32_0 = arith.constant 0 : i32
    return %c0_i32, %arg1 : i32, i32
  }
  func.func @transform_2(%arg0: i32, %arg1: i32) -> (i32, i32) {
    %c0_i32 = arith.constant 0 : i32
    %c0_i32_0 = arith.constant 0 : i32
    return %c0_i32, %arg1 : i32, i32
  }
  func.func @transform_3(%arg0: i32, %arg1: i32) -> (i32, i32) {
    %c0_i32 = arith.constant 0 : i32
    %c0_i32_0 = arith.constant 0 : i32
    return %arg1, %c0_i32 : i32, i32
  }
  func.func @transform_4(%arg0: i32, %arg1: i32) -> (i32, i32) {
    %c0_i32 = arith.constant 0 : i32
    %c0_i32_0 = arith.constant 0 : i32
    %c0_i32_1 = arith.constant 0 : i32
    return %c0_i32, %c0_i32_0 : i32, i32
  }
  func.func @transform_5(%arg0: i32, %arg1: i32) -> (i32, i32) {
    %c0_i32 = arith.constant 0 : i32
    %c0_i32_0 = arith.constant 0 : i32
    return %arg0, %c0_i32 : i32, i32
  }
}

</mosaic_0001>

<bundles_post_ra>
// kernel: mlp_forward.1
= control target key start
LH: loop header
LB: loop body
LE: loop exit
PB: predicated region body
PF: predicated region fallthrough
CT: control target
= control target key end

     0   :  { %10 = vsyncpa [#allocation4], 0  ;;  %s1010_s0 = inlined_call_operand.vmem [shape: bf16[16,32], index: 0, kind: input, shape index: {}]   ;;  %s1011_s1 = inlined_call_operand.vmem [shape: bf16[32,128], index: 1, kind: input, shape index: {}]   ;;  %s1012_s2 = inlined_call_operand.vmem [shape: f32[1,128], index: 2, kind: input, shape index: {}]   ;;  %s1013_s3 = inlined_call_operand.vmem [shape: bf16[128,32], index: 3, kind: input, shape index: {}]   ;;  %s1014_s4 = inlined_call_operand.vmem [shape: f32[1,32], index: 4, kind: input, shape index: {}]   ;;  %s1015_s5 = inlined_call_operand.hbm [shape: f32[16,32], index: 5, kind: output, shape index: {}]  }
   0x1   :  { %12 = vsyncpa [#allocation4 + $0x1], 0  ;;  %s858_s18 = smov 0   ;;  %s860_s19 = smov 0  }
   0x2   :  { %s862_s20 = smov 0   ;;  %s864_s21 = smov 0  }
   0x3   :  { %s866_s22 = smov 0   ;;  %s868_s23 = smov 0  }
   0x4 LB: > { %s609_s24 = sadd.s32 4294967295, %s823_s23   ;;  %s610_s25 = sadd.s32 4294967294, %s823_s23   ;;  %s823_s23 = sphi %s868_s23, %s18_s23   ;;  %s819_s22 = sphi %s866_s22, %s1022_s22   ;;  %s815_s21 = sphi %s864_s21, %s1021_s21   ;;  %s811_s20 = sphi %s862_s20, %s1020_s20   ;;  %s807_s19 = sphi %s860_s19, %s1019_s19   ;;  %s803_s18 = sphi %s858_s18, %s1018_s18  }
   0x5   : > { %s30_s26 = sadd.s32 1, %s819_s22  ;;  %s162_s27 = sadd.s32 1, %s811_s20 }
   0x6   : > { %p32_p0 = scmp.ge.s32.totalorder %s30_s26, 2  ;;  %p172_p1 = scmp.ne.s32.totalorder %s811_s20, %s807_s19 }
   0x7   : > { %p173_p2 = scmp.eq.s32.totalorder %s609_s24, 1  ;;  %p178_p3 = scmp.ne.s32.totalorder %s807_s19, %s803_s18 }
   0x8   : > { %s1024_s26 = smov (%p32_p0, %s30_s26), 0  ;;  %p179_p5 = scmp.eq.s32.totalorder %s610_s25, 1 }
   0x9   : > { %p898_p4 = por %p173_p2, %p172_p1  ;;  %s159_s29 = ssub.s32 %s819_s22, %s1024_s26 }
   0xa   : > { %p616_p6 = scmp.ge.s32.totalorder %s823_s23, 1  ;;  %p160_p7 = scmp.eq.s32.totalorder %s159_s29, 0 }
   0xb   : > { %p905_p8 = por %p179_p5, %p178_p3  ;;  %p229_p9 = scmp.lt.s32.totalorder %s823_s23, 3 }
   0xc   : > { %s911_s6 = scalar_select %p160_p7, %s811_s20, %s162_s27  }
   0xd   : > { %p230_p10 = pnand %p616_p6, %p229_p9 }
   0xe   : > { %v733_v0 = vld [vmem:[%s1011_s1] sm:$0xff] (!%p230_p10)   ;;  %v825_v1 = vmov (!%p230_p10), 0.0   ;;  %v734_v2 = vld [vmem:[%s1011_s1 + $0x8] sm:$0xff] (!%p230_p10)   ;;  %vm826_vm0 = vmmov (!%p230_p10), 0   ;;  %p268_p11 = scmp.lt.s32.totalorder (!%p230_p10), %s815_s21, 1  ;;  %vm290_vm1 = vcmask (!%p230_p10), 261120  }
   0xf   : > { %233 = sbr.rel (%p230_p10) target bundleno = 498 (0x1f2), region = 40  ;;  %648 = vmatprep.subr.bf16.mxu0 (!%p230_p10), %v825_v1  ;;  %656 = vmatprep.subr.bf16.mxu1 (!%p230_p10), %v825_v1  ;;  %291 = vst.msk [vmem:[#allocation2] sm:$0xff] (!%p230_p10), %vm290_vm1, %v825_v1  ;;  %v735_v3 = vld [vmem:[%s1013_s3] sm:$0xff] (!%p230_p10)   ;;  %v736_v4 = vld [vmem:[%s1013_s3 + $0x8] sm:$0xff] (!%p230_p10)   ;;  %v737_v6 = vld [vmem:[%s1013_s3 + $0x10] sm:$0xff] (!%p230_p10)   ;;  %s633_s8 = sshll.u32 (!%p230_p10), %s815_s21, 7 }
  0x10   : > { %649 = vmatpush3.bf16.msra.mxu0 (!%p230_p10), %v733_v0  ;;  %652 = vmatprep.mubr.msk.bf16.mxu0 (!%p230_p10), %vm826_vm0, %v825_v1  ;;  %v738_v7 = vld [vmem:[%s1013_s3 + $0x18] sm:$0xff] (!%p230_p10)   ;;  %v739_v8 = vld [vmem:[%s1013_s3 + $0x20] sm:$0xff] (!%p230_p10)   ;;  %v740_v9 = vld [vmem:[%s1013_s3 + $0x28] sm:$0xff] (!%p230_p10)  }
  0x11   : > { %650 = vmatprep.subr.bf16.mxu0 (!%p230_p10), %v825_v1  ;;  %672 = vmatprep.mubr.msk.bf16.mxu1 (!%p230_p10), %vm826_vm0, %v825_v1  ;;  %v741_v10 = vld [vmem:[%s1013_s3 + $0x30] sm:$0xff] (!%p230_p10)   ;;  %v742_v11 = vld [vmem:[%s1013_s3 + $0x38] sm:$0xff] (!%p230_p10)   ;;  %v619_v12 = vld [vmem:[%s1012_s2] ss:$0 sm:$0xff] (!%p230_p10) }
  0x12   : > { %657 = vmatpush3.bf16.msra.mxu1 (!%p230_p10), %v735_v3  ;;  %v631_v30 = vld [vmem:[%s1014_s4] ss:$0 sm:$0xff] (!%p230_p10) }
  0x13   : > { %658 = vmatprep.subr.bf16.mxu1 (!%p230_p10), %v825_v1 }
  0x14   : > { %651 = vmatpush3.bf16.msra.mxu0 (!%p230_p10), %v734_v2 }
  0x16   : > { %s269_s13 = scalar_select %p268_p11, %s815_s21, 1  ;;  %659 = vmatpush3.bf16.msra.mxu1 %v736_v4  ;;  %v365_v24 = vld [vmem:[#allocation2] sm:$0xff] }
  0x17   : > { %660 = vmatprep.subr.bf16.mxu1 %v825_v1  ;;  %s827_s21 = smov [#allocation3]  }
  0x18   : > { %s618_s16 = sshll.u32 %s269_s13, 2  ;;  %s962_s13 = scalar_lea.hbm %s1015_s5, %s633_s8 }
  0x19   : > { %s271_s25 = scalar_lea.vmem %s1010_s0, %s618_s16  ;;  %s749_s16 = sshll.u32 %s827_s21, 4  ;;  %s750_s16 = int_to_ptr.vmem [resolvable:$false] %s749_s16 }
  0x1a   : > { %v292_v5 = vld [vmem:[%s271_s25] sm:$0xf]  ;;  %661 = vmatpush3.bf16.msra.mxu1 %v737_v6  ;;  %s265_s25 = sand.u32 1, %s807_s19   ;;  %s751_s17 = scalar_lea.vmem %s750_s16, 256 }
  0x1b   : > { %653 = vmatmul.mubr.msk.bf16.vlgmr.msra.gmra.mrb[0].mxu0 %vm290_vm1, %v292_v5  ;;  %662 = vmatprep.subr.bf16.mxu1 %v825_v1  ;;  %s617_s27 = sshll.u32 %s265_s25, 3  ;;  %s487_s14 = scalar_lea.sflag [#allocation4], %s265_s25 }
  0x1c   : > { %s267_s9 = scalar_lea.vmem [#allocation3], %s617_s27 }
  0x1d   : > { %s500_s10 = sshll.u32 %s267_s9, 4  ;;  %s964_s10 = int_to_ptr.vmem [resolvable:$true] %s500_s10 }
  0x1e   : > { %663 = vmatpush3.bf16.msra.mxu1 %v738_v7  ;;  %s745_s15 = scalar_lea.vmem %s964_s10, 128  ;;  %p752_p1 = scmp.lt.s32.totalorder %s964_s10, %s750_s16 }
  0x1f   : > { %664 = vmatprep.subr.bf16.mxu1 %v825_v1  ;;  %p746_p12 = scmp.ne.s32.totalorder %s964_s10, %s745_s15  ;;  %p753_p2 = scmp.lt.s32.totalorder %s751_s17, %s745_s15 }
  0x21   : > { %p747_p13 = pnand %p746_p12, %p898_p4  ;;  %p754_p3 = por %p753_p2, %p752_p1 }
  0x22   : > { %665 = vmatpush3.bf16.msra.mxu1 %v739_v8 }
  0x23   : > { %666 = vmatprep.subr.bf16.mxu1 %v825_v1  ;;  %p748_p0 = pneg %p747_p13 }
  0x25   : > { %p755_p5 = pnand %p754_p3, %p748_p0 }
  0x26   : > { %667 = vmatpush3.bf16.msra.mxu1 %v740_v9 }
  0x27   : > { %668 = vmatprep.subr.bf16.mxu1 %v825_v1 }
  0x2a   : > { %669 = vmatpush3.bf16.msra.mxu1 %v741_v10 }
  0x2b   : > { %670 = vmatprep.subr.bf16.mxu1 %v825_v1 }
  0x2e   : > { %671 = vmatpush3.bf16.msra.mxu1 %v742_v11 }
  0xee   : > { %v354_v13 = vpop.f32.mrb[0].mxu0 }
  0xef   : > { %v355_v14 = vadd.f32 %v619_v12, %v354_v13  ;;  %v654_v15 = vpop.f32.mrb[1].mxu0 }
  0xf0   : > { %v357_v16 = vpop.f32.mrb[2].mxu0 }
  0xf1   : > { %v361_v17 = vmul.f32 0.70710677, %v355_v14  ;;  %v655_v18 = vpop.f32.mrb[3].mxu0  ;;  %v360_v20 = vmul.f32 0.5, %v355_v14 }
  0xf3   : > { %743 = verf.f32 %v361_v17 }
  0xfd   : > { %v744_v19 = vpop.eup %743 }
  0xfe   : > { %v363_v21 = vadd.f32 1.0, %v744_v19 }
 0x100   : > { %v364_v22 = vmul.f32 %v363_v21, %v360_v20 }
 0x102   : > { %v366_v23 = vpack.c.bf16 %v364_v22, %v364_v22 }
 0x104   : > { %673 = vmatmul.mubr.bf16.vlgmr.msra.gmra.mrb[0].mxu1 %v366_v23 }
 0x1d7   : > { %v465_v25 = vpop.f32.mrb[0].mxu1 }
 0x1d8   : > { %v471_v26 = vadd.f32 %v465_v25, %v365_v24  ;;  %v674_v27 = vpop.f32.mrb[1].mxu1 }
 0x1d9   : > { %v468_v28 = vpop.f32.mrb[2].mxu1 }
 0x1da   : > { %472 = vst.msk [vmem:[#allocation2] sm:$0xff] %vm290_vm1, %v471_v26  ;;  %v675_v29 = vpop.f32.mrb[3].mxu1 }
 0x1e1   : > { %v476_v31 = vld [vmem:[#allocation2] sm:$0xff] }
 0x1e2   : > { %v484_v32 = vadd.f32 %v631_v30, %v476_v31 }
 0x1e4   : > { %485 = vst.msk [vmem:[%s267_s9] sm:$0xff] %vm290_vm1, %v484_v32 }
 0x1e5   : > { %758 = shalt.err (!%p755_p5)
}
 0x1e6   : > { %s759_s24 = scalar_lea.hbm %s962_s13, 128  ;;  %s763_s29 = scalar_lea.hbm %s1015_s5, 256 }
 0x1e7   : > { %p760_p6 = scmp.ne.s32.totalorder %s962_s13, %s759_s24  ;;  %p764_p10 = scmp.lt.u32.totalorder %s962_s13, %s1015_s5 }
 0x1e8   : > { %p765_p11 = scmp.lt.u32.totalorder %s763_s29, %s759_s24  ;;  %p767_p13 = scmp.lt.u32.totalorder %s759_s24, %s962_s13 }
 0x1e9   : > { %p761_p7 = pnand %p760_p6, %p898_p4 }
 0x1ea   : > { %p766_p12 = por %p765_p11, %p764_p10 }
 0x1eb   : > { %p762_p9 = pneg %p761_p7 }
 0x1ec   : > { %p768_p0 = por %p767_p13, %p766_p12 }
 0x1ee   : > { %p769_p1 = pnand %p768_p0, %p762_p9 }
 0x1f0   : > { %772 = shalt.err (!%p769_p1)
}
 0x1f1   : > { %676 = dma.vmem_to_hbm [thread:$0]  (%p898_p4), %s964_s10, 128, %s962_s13, %s487_s14  }
 0x1f2 PF: > { %p682_p2 = scmp.ge.s32.totalorder %s823_s23, 2  ;;  %s512_s9 = sand.u32 1, %s803_s18  }
 0x1f3   : > { %s513_s11 = scalar_lea.sflag [#allocation4], %s512_s9 }
 0x1f4   : > { %p679_p3 = pnand %p682_p2, %p905_p8 }
 0x1f6   : > { %798 = dma.done.wait (!%p679_p3), %s513_s11, 128  }
 0x1f7   : > { %800 = vsyncadd (!%p679_p3), %s513_s11, 4294967168  ;;  %s18_s23 = sadd.s32 1, %s823_s23   ;;  %s1018_s18 = smov %s807_s19 }
 0x1f8   : > { %p15_p5 = scmp.ge.s32.totalorder %s18_s23, 4   ;;  %s1019_s19 = smov %s811_s20 }
 0x1f9   : > { %s1020_s20 = smov %s911_s6  ;;  %s1021_s21 = smov %s819_s22 }
 0x1fa   : > { %s1022_s22 = smov %s1024_s26  ;;  %17 = sbr.rel (!%p15_p5) target bundleno = 4 (0x4), region = 92 }
 0x201   :  { %518 = vsyncpa [#allocation4], 1 }
 0x202   :  { %520 = vsyncpa [#allocation4 + $0x1], 1 }

</bundles_post_ra>
